<compile_context>
chip_gen: v7x
topology: tpu7x:2x2x1
jax: 0.10.0
libtpu: 0.0.40
codegen_flags: <defaults>
</compile_context>

<pallas_src>
import math

import jax
import jax.numpy as jnp
import numpy as np
from jax import lax
from jax.experimental import pallas as pl
from jax.experimental.pallas import tpu as pltpu


# ------------------------- model hyper-params (small) -------------------------
BATCH = 2
SEQ = 8
HIDDEN = 32
NUM_HEADS = 4
HEAD_DIM = HIDDEN // NUM_HEADS
INNER = 4 * HIDDEN
LN_EPS = 1e-5
MASK_VALUE = -10000.0  # GPT2Attention.masked_bias

# Rows of the packed small-vector table (each row padded to INNER=128 lanes).
(ROW_LN1_G, ROW_LN1_B, ROW_LN2_G, ROW_LN2_B,
 ROW_B_O, ROW_B_PR, ROW_B_FC, ROW_B_QKV) = range(8)
NUM_VEC_ROWS = 8


# ------------------------------ in-kernel helpers -----------------------------
def _layernorm(x, gamma, beta, eps):
    # x: (N, D); gamma/beta: (1, D) — all f32 (v5e has no bf16 VPU/EUP)
    mu = jnp.mean(x, axis=-1, keepdims=True)
    var = jnp.mean((x - mu) ** 2, axis=-1, keepdims=True)
    return (x - mu) * lax.rsqrt(var + eps) * gamma + beta


def _new_gelu(x):
    # HF NewGELUActivation ("gelu_new"), f32
    c = math.sqrt(2.0 / math.pi)
    return 0.5 * x * (1.0 + jnp.tanh(c * (x + 0.044715 * x * x * x)))


def _bf16(t):
    return t.astype(jnp.bfloat16)


# --------------------------------- the kernel ---------------------------------
def gpt2_block_kernel(
    x_ref,      # (N, D)  f32      flattened rows of this block
    w_qkv_ref,  # (D, 3D) bf16     fused QKV projection (Conv1D layout)
    w_o_ref,    # (D, D)  bf16     attention output projection
    w_fc_ref,   # (D, INNER) bf16
    w_pr_ref,   # (INNER, D) bf16
    vec_ref,    # (NUM_VEC_ROWS, INNER) f32  packed small vectors
    mask_ref,   # (N, N)  f32      precomputed block-diagonal causal bias
    o_ref,      # (N, D)  f32
):
    x = x_ref[...]                       # (N, D) f32

    vecs = vec_ref[...]                  # (8, INNER)
    ln1_g = vecs[ROW_LN1_G:ROW_LN1_G + 1, :HIDDEN]
    ln1_b = vecs[ROW_LN1_B:ROW_LN1_B + 1, :HIDDEN]
    ln2_g = vecs[ROW_LN2_G:ROW_LN2_G + 1, :HIDDEN]
    ln2_b = vecs[ROW_LN2_B:ROW_LN2_B + 1, :HIDDEN]
    b_o   = vecs[ROW_B_O:ROW_B_O + 1, :HIDDEN]
    b_pr  = vecs[ROW_B_PR:ROW_B_PR + 1, :HIDDEN]
    b_fc  = vecs[ROW_B_FC:ROW_B_FC + 1, :]
    b_qkv = vecs[ROW_B_QKV:ROW_B_QKV + 1, :3 * HIDDEN]

    mask_bias = mask_ref[...]            # (N, N) additive causal bias

    # ---------------- ln_1 + causal self-attention ----------------
    h = _layernorm(x, ln1_g, ln1_b, LN_EPS)

    # One fused QKV matmul (bf16 operands, f32 accumulation), bias folded in.
    qkv = jnp.dot(_bf16(h), w_qkv_ref[...],
                  preferred_element_type=jnp.float32) + b_qkv   # (N, 3D) f32

    inv_sqrt_dk = 1.0 / math.sqrt(HEAD_DIM)  # scale_attn_weights=True

    # Per-head softmax-attention; static lane slices of the fused QKV tile.
    # Unrolled Python loop: heads are independent, so MXU pushes of head h+1
    # overlap with EUP exp / XLU reductions of head h.
    ctx_heads = []
    for hd in range(NUM_HEADS):
        q = qkv[:, hd * HEAD_DIM:(hd + 1) * HEAD_DIM]
        k = qkv[:, HIDDEN + hd * HEAD_DIM:HIDDEN + (hd + 1) * HEAD_DIM]
        v = qkv[:, 2 * HIDDEN + hd * HEAD_DIM:2 * HIDDEN + (hd + 1) * HEAD_DIM]

        # scores = q @ k^T (contract last dims; no explicit transpose)
        s = lax.dot_general(_bf16(q), _bf16(k), (((1,), (1,)), ((), ())),
                            preferred_element_type=jnp.float32)
        s = s * inv_sqrt_dk + mask_bias

        # softmax along keys (f32; EUP reciprocal for the denominator)
        s = s - jnp.max(s, axis=-1, keepdims=True)
        e = jnp.exp(s)
        p = e * pl.reciprocal(jnp.sum(e, axis=-1, keepdims=True), approx=True)

        ctx_heads.append(jnp.dot(_bf16(p), _bf16(v),
                                 preferred_element_type=jnp.float32))  # (N, HD)

    # Lane-concatenate heads into one (N, D) tile, single output projection.
    ctx = jnp.concatenate(ctx_heads, axis=-1)                  # (N, D)
    attn_out = jnp.dot(_bf16(ctx), w_o_ref[...],
                       preferred_element_type=jnp.float32) + b_o

    h1 = x + attn_out  # residual

    # ------------------------- ln_2 + MLP --------------------------
    h2 = _layernorm(h1, ln2_g, ln2_b, LN_EPS)
    a = jnp.dot(_bf16(h2), w_fc_ref[...],
                preferred_element_type=jnp.float32) + b_fc
    a = _new_gelu(a)
    m = jnp.dot(_bf16(a), w_pr_ref[...],
                preferred_element_type=jnp.float32) + b_pr

    o_ref[...] = (h1 + m).astype(o_ref.dtype)


# --------------------------------- wrapper ------------------------------------
def _tc_groups(batch, seq):
    """Grid steps along batch.  Only split across TensorCores (v7x) when each
    core gets a meaningful amount of work (>= 512 rows); otherwise the second
    grid step's ~0.35us overhead + duplicated weight DMAs outweigh the split."""
    rows = batch * seq
    try:
        kind = jax.devices()[0].device_kind.lower()
    except Exception:
        return 1
    n_tc = 2 if ("v7" in kind or "7x" in kind) else 1
    if n_tc > 1 and batch % n_tc == 0 and (rows // n_tc) >= 512:
        return n_tc
    return 1


def _pad_row(v, width):
    v = jnp.asarray(v, jnp.float32).reshape(-1)
    return jnp.pad(v, (0, width - v.shape[0]))


def gpt2_block(x, params):
    B, S, D = x.shape
    assert S == SEQ and D == HIDDEN

    groups = _tc_groups(B, S)
    rows_per_block = (B // groups) * S

    # Flatten batch*seq so the whole slab is one grid step (or split per TC).
    x2d = x.reshape(B * S, D)

    # --- layout plumbing (in a real model this is done once at weight load) ---
    # Big matmul weights pre-cast to bf16 (MXU-native; halves their DMA bytes).
    w_qkv = params["w_qkv"].astype(jnp.bfloat16)   # (D, 3D), Conv1D layout
    w_o   = params["w_o"].astype(jnp.bfloat16)     # (D, D)
    w_fc  = params["w_fc"].astype(jnp.bfloat16)    # (D, INNER)
    w_pr  = params["w_pr"].astype(jnp.bfloat16)    # (INNER, D)

    # Pack all small vectors (LN params + all biases) into one (8, 128) table.
    vec_table = jnp.stack([
        _pad_row(params["ln1_g"], INNER),
        _pad_row(params["ln1_b"], INNER),
        _pad_row(params["ln2_g"], INNER),
        _pad_row(params["ln2_b"], INNER),
        _pad_row(params["b_o"], INNER),
        _pad_row(params["b_pr"], INNER),
        _pad_row(params["b_fc"], INNER),
        _pad_row(params["b_qkv"], INNER),
    ])  # (NUM_VEC_ROWS, INNER)

    # Block-diagonal causal mask as an additive bias, precomputed on the host.
    # Row r belongs to batch r//SEQ; attend only within the same batch and to
    # keys at or before the query position.  Identical pattern for every group.
    r = np.arange(rows_per_block)[:, None]
    c = np.arange(rows_per_block)[None, :]
    allowed = (r // SEQ == c // SEQ) & (c <= r)
    mask_bias = jnp.asarray(np.where(allowed, 0.0, MASK_VALUE), jnp.float32)

    def full(shape):
        return pl.BlockSpec(shape, lambda g: (0,) * len(shape))

    out2d = pl.pallas_call(
        gpt2_block_kernel,
        out_shape=jax.ShapeDtypeStruct((B * S, D), x.dtype),
        grid_spec=pltpu.PrefetchScalarGridSpec(
            num_scalar_prefetch=0,
            grid=(groups,),
            in_specs=[
                pl.BlockSpec((rows_per_block, D), lambda g: (g, 0)),  # x rows
                full(w_qkv.shape),
                full(w_o.shape),
                full(w_fc.shape),
                full(w_pr.shape),
                full(vec_table.shape),
                full(mask_bias.shape),
            ],
            out_specs=pl.BlockSpec((rows_per_block, D), lambda g: (g, 0)),
        ),
        compiler_params=pltpu.CompilerParams(
            dimension_semantics=("parallel",),
        ),
    )(x2d, w_qkv, w_o, w_fc, w_pr, vec_table, mask_bias)

    return out2d.reshape(B, S, D)


# --------------------------- pure-JAX reference --------------------------------
def gpt2_block_ref(x, p):
    def ln(t, g, b):
        mu = jnp.mean(t, axis=-1, keepdims=True)
        var = jnp.mean((t - mu) ** 2, axis=-1, keepdims=True)
        return (t - mu) / jnp.sqrt(var + LN_EPS) * g + b

    B, S, D = x.shape
    h = ln(x, p["ln1_g"], p["ln1_b"])
    qkv = h @ p["w_qkv"] + p["b_qkv"]
    q, k, v = jnp.split(qkv, 3, axis=-1)

    def split_heads(t):
        return t.reshape(B, S, NUM_HEADS, HEAD_DIM).transpose(0, 2, 1, 3)

    q, k, v = split_heads(q), split_heads(k), split_heads(v)
    scores = jnp.einsum("bhqd,bhkd->bhqk", q, k) / math.sqrt(HEAD_DIM)
    causal = jnp.tril(jnp.ones((S, S), bool))
    scores = jnp.where(causal, scores, MASK_VALUE)
    probs = jax.nn.softmax(scores, axis=-1)
    ao = jnp.einsum("bhqk,bhkd->bhqd", probs, v)
    ao = ao.transpose(0, 2, 1, 3).reshape(B, S, D)
    ao = ao @ p["w_o"] + p["b_o"]
    h1 = x + ao

    h2 = ln(h1, p["ln2_g"], p["ln2_b"])
    a = h2 @ p["w_fc"] + p["b_fc"]
    c = math.sqrt(2.0 / math.pi)
    a = 0.5 * a * (1.0 + jnp.tanh(c * (a + 0.044715 * a ** 3)))
    m = a @ p["w_pr"] + p["b_pr"]
    return h1 + m


# ----------------------------------- main --------------------------------------
if __name__ == "__main__":
    key = jax.random.PRNGKey(0)
    ks = jax.random.split(key, 8)

    # Conv1D weights: normal(std=0.02), biases zero; LayerNorm: gamma=1, beta=0.
    params = {
        "ln1_g": jnp.ones((1, HIDDEN), jnp.float32),
        "ln1_b": jnp.zeros((1, HIDDEN), jnp.float32),
        "w_qkv": 0.02 * jax.random.normal(ks[0], (HIDDEN, 3 * HIDDEN), jnp.float32),
        "b_qkv": jnp.zeros((1, 3 * HIDDEN), jnp.float32),
        "w_o":   0.02 * jax.random.normal(ks[1], (HIDDEN, HIDDEN), jnp.float32),
        "b_o":   jnp.zeros((1, HIDDEN), jnp.float32),
        "ln2_g": jnp.ones((1, HIDDEN), jnp.float32),
        "ln2_b": jnp.zeros((1, HIDDEN), jnp.float32),
        "w_fc":  0.02 * jax.random.normal(ks[2], (HIDDEN, INNER), jnp.float32),
        "b_fc":  jnp.zeros((1, INNER), jnp.float32),
        "w_pr":  0.02 * jax.random.normal(ks[3], (INNER, HIDDEN), jnp.float32),
        "b_pr":  jnp.zeros((1, HIDDEN), jnp.float32),
    }

    x = jax.random.normal(ks[4], (BATCH, SEQ, HIDDEN), jnp.float32)

    out = jax.block_until_ready(gpt2_block(x, params))
    ref = jax.block_until_ready(gpt2_block_ref(x, params))

    # Tolerance accommodates bf16 MXU operands + approximate (EUP) softmax
    # reciprocal; any real bug (mask/layout/fusion) is orders of magnitude
    # larger than 1e-2.
    np.testing.assert_allclose(np.asarray(out), np.asarray(ref), rtol=1e-2, atol=1e-2)

    print("KERNEL_OK")
</pallas_src>

<mosaic_0001>
module attributes {stable_mosaic.version = 11 : i64} {
  func.func @gpt2_block_kernel(%arg0: i32, %arg1: memref<16x32xf32, #tpu.memory_space<vmem>>, %arg2: memref<32x96xbf16, #tpu.memory_space<vmem>>, %arg3: memref<32x32xbf16, #tpu.memory_space<vmem>>, %arg4: memref<32x128xbf16, #tpu.memory_space<vmem>>, %arg5: memref<128x32xbf16, #tpu.memory_space<vmem>>, %arg6: memref<8x128xf32, #tpu.memory_space<vmem>>, %arg7: memref<16x16xf32, #tpu.memory_space<vmem>>, %arg8: memref<16x32xf32, #tpu.memory_space<vmem>>) attributes {dimension_semantics = [#tpu.dimension_semantics<parallel>], iteration_bounds = array<i64: 1>, scalar_prefetch = 0 : i64, scratch_operands = 0 : i64, tpu.core_type = #tpu.core_type<tc>, window_params = [{transform_indices = @transform_0, window_bounds = array<i64: 16, 32>}, {pipeline_mode = #tpu.pipeline_mode<synchronous>, transform_indices = @transform_1, window_bounds = array<i64: 32, 96>}, {pipeline_mode = #tpu.pipeline_mode<synchronous>, transform_indices = @transform_2, window_bounds = array<i64: 32, 32>}, {pipeline_mode = #tpu.pipeline_mode<synchronous>, transform_indices = @transform_3, window_bounds = array<i64: 32, 128>}, {pipeline_mode = #tpu.pipeline_mode<synchronous>, transform_indices = @transform_4, window_bounds = array<i64: 128, 32>}, {pipeline_mode = #tpu.pipeline_mode<synchronous>, transform_indices = @transform_5, window_bounds = array<i64: 8, 128>}, {pipeline_mode = #tpu.pipeline_mode<synchronous>, transform_indices = @transform_6, window_bounds = array<i64: 16, 16>}, {transform_indices = @transform_7, window_bounds = array<i64: 16, 32>}]} {
    %c0 = arith.constant 0 : index
    %c0_0 = arith.constant 0 : index
    %0 = vector.load %arg1[%c0, %c0_0] : memref<16x32xf32, #tpu.memory_space<vmem>>, vector<16x32xf32>
    %c0_1 = arith.constant 0 : index
    %c0_2 = arith.constant 0 : index
    %1 = vector.load %arg6[%c0_1, %c0_2] : memref<8x128xf32, #tpu.memory_space<vmem>>, vector<8x128xf32>
    %2 = vector.extract_strided_slice %1 {offsets = [0, 0], sizes = [1, 32], strides = [1, 1]} : vector<8x128xf32> to vector<1x32xf32>
    %3 = vector.extract_strided_slice %1 {offsets = [1, 0], sizes = [1, 32], strides = [1, 1]} : vector<8x128xf32> to vector<1x32xf32>
    %4 = vector.extract_strided_slice %1 {offsets = [2, 0], sizes = [1, 32], strides = [1, 1]} : vector<8x128xf32> to vector<1x32xf32>
    %5 = vector.extract_strided_slice %1 {offsets = [3, 0], sizes = [1, 32], strides = [1, 1]} : vector<8x128xf32> to vector<1x32xf32>
    %6 = vector.extract_strided_slice %1 {offsets = [4, 0], sizes = [1, 32], strides = [1, 1]} : vector<8x128xf32> to vector<1x32xf32>
    %7 = vector.extract_strided_slice %1 {offsets = [5, 0], sizes = [1, 32], strides = [1, 1]} : vector<8x128xf32> to vector<1x32xf32>
    %8 = vector.extract_strided_slice %1 {offsets = [6, 0], sizes = [1, 128], strides = [1, 1]} : vector<8x128xf32> to vector<1x128xf32>
    %9 = vector.extract_strided_slice %1 {offsets = [7, 0], sizes = [1, 96], strides = [1, 1]} : vector<8x128xf32> to vector<1x96xf32>
    %c0_3 = arith.constant 0 : index
    %c0_4 = arith.constant 0 : index
    %10 = vector.load %arg7[%c0_3, %c0_4] : memref<16x16xf32, #tpu.memory_space<vmem>>, vector<16x16xf32>
    %cst = arith.constant dense<0.000000e+00> : vector<16xf32>
    %11 = vector.multi_reduction <add>, %0, %cst [1] : vector<16x32xf32> to vector<16xf32>
    %12 = vector.shape_cast %11 : vector<16xf32> to vector<16x1xf32>
    %cst_5 = arith.constant 3.200000e+01 : f32
    %13 = vector.broadcast %cst_5 : f32 to vector<16x1xf32>
    %14 = arith.divf %12, %13 : vector<16x1xf32>
    %15 = vector.broadcast %14 : vector<16x1xf32> to vector<16x32xf32>
    %16 = arith.subf %0, %15 : vector<16x32xf32>
    %17 = arith.mulf %16, %16 : vector<16x32xf32>
    %cst_6 = arith.constant dense<0.000000e+00> : vector<16xf32>
    %18 = vector.multi_reduction <add>, %17, %cst_6 [1] : vector<16x32xf32> to vector<16xf32>
    %19 = vector.shape_cast %18 : vector<16xf32> to vector<16x1xf32>
    %cst_7 = arith.constant 3.200000e+01 : f32
    %20 = vector.broadcast %cst_7 : f32 to vector<16x1xf32>
    %21 = arith.divf %19, %20 : vector<16x1xf32>
    %22 = vector.broadcast %14 : vector<16x1xf32> to vector<16x32xf32>
    %23 = arith.subf %0, %22 : vector<16x32xf32>
    %cst_8 = arith.constant 9.99999974E-6 : f32
    %24 = vector.broadcast %cst_8 : f32 to vector<16x1xf32>
    %25 = arith.addf %21, %24 : vector<16x1xf32>
    %26 = math.rsqrt %25 : vector<16x1xf32>
    %27 = vector.broadcast %26 : vector<16x1xf32> to vector<16x32xf32>
    %28 = arith.mulf %23, %27 : vector<16x32xf32>
    %29 = vector.broadcast %2 : vector<1x32xf32> to vector<16x32xf32>
    %30 = arith.mulf %28, %29 : vector<16x32xf32>
    %31 = vector.broadcast %3 : vector<1x32xf32> to vector<16x32xf32>
    %32 = arith.addf %30, %31 : vector<16x32xf32>
    %33 = arith.truncf %32 : vector<16x32xf32> to vector<16x32xbf16>
    %c0_9 = arith.constant 0 : index
    %c0_10 = arith.constant 0 : index
    %34 = vector.load %arg2[%c0_9, %c0_10] : memref<32x96xbf16, #tpu.memory_space<vmem>>, vector<32x96xbf16>
    %cst_11 = arith.constant dense<0.000000e+00> : vector<16x96xf32>
    %35 = tpu.matmul %33, %34, %cst_11 {dimension_numbers = #tpu.dot_dimension_numbers<[1], [0], [0], [1], [0, 0, 1, 1], [], []>} : vector<16x32xbf16>, vector<32x96xbf16>, vector<16x96xf32> -> vector<16x96xf32>
    %36 = vector.broadcast %9 : vector<1x96xf32> to vector<16x96xf32>
    %37 = arith.addf %35, %36 : vector<16x96xf32>
    %38 = vector.extract_strided_slice %37 {offsets = [0, 0], sizes = [16, 8], strides = [1, 1]} : vector<16x96xf32> to vector<16x8xf32>
    %39 = vector.extract_strided_slice %37 {offsets = [0, 32], sizes = [16, 8], strides = [1, 1]} : vector<16x96xf32> to vector<16x8xf32>
    %40 = vector.extract_strided_slice %37 {offsets = [0, 64], sizes = [16, 8], strides = [1, 1]} : vector<16x96xf32> to vector<16x8xf32>
    %41 = arith.truncf %38 : vector<16x8xf32> to vector<16x8xbf16>
    %42 = arith.truncf %39 : vector<16x8xf32> to vector<16x8xbf16>
    %cst_12 = arith.constant dense<0.000000e+00> : vector<16x16xf32>
    %43 = tpu.matmul %41, %42, %cst_12 {dimension_numbers = #tpu.dot_dimension_numbers<[1], [1], [0], [0], [0, 0, 1, 0], [], []>} : vector<16x8xbf16>, vector<16x8xbf16>, vector<16x16xf32> -> vector<16x16xf32>
    %cst_13 = arith.constant 0.353553385 : f32
    %44 = vector.broadcast %cst_13 : f32 to vector<16x16xf32>
    %45 = arith.mulf %43, %44 : vector<16x16xf32>
    %46 = arith.addf %45, %10 : vector<16x16xf32>
    %cst_14 = arith.constant dense<0xFF800000> : vector<16xf32>
    %47 = vector.multi_reduction <maximumf>, %46, %cst_14 [1] : vector<16x16xf32> to vector<16xf32>
    %48 = vector.shape_cast %47 : vector<16xf32> to vector<16x1xf32>
    %49 = vector.broadcast %48 : vector<16x1xf32> to vector<16x16xf32>
    %50 = arith.subf %46, %49 : vector<16x16xf32>
    %51 = math.exp %50 : vector<16x16xf32>
    %cst_15 = arith.constant dense<0.000000e+00> : vector<16xf32>
    %52 = vector.multi_reduction <add>, %51, %cst_15 [1] : vector<16x16xf32> to vector<16xf32>
    %53 = vector.shape_cast %52 : vector<16xf32> to vector<16x1xf32>
    %54 = tpu.reciprocal %53 {approx = true} : vector<16x1xf32> -> vector<16x1xf32>
    %55 = vector.broadcast %54 : vector<16x1xf32> to vector<16x16xf32>
    %56 = arith.mulf %51, %55 : vector<16x16xf32>
    %57 = arith.truncf %56 : vector<16x16xf32> to vector<16x16xbf16>
    %58 = arith.truncf %40 : vector<16x8xf32> to vector<16x8xbf16>
    %cst_16 = arith.constant dense<0.000000e+00> : vector<16x8xf32>
    %59 = tpu.matmul %57, %58, %cst_16 {dimension_numbers = #tpu.dot_dimension_numbers<[1], [0], [0], [1], [0, 0, 1, 1], [], []>} : vector<16x16xbf16>, vector<16x8xbf16>, vector<16x8xf32> -> vector<16x8xf32>
    %60 = vector.extract_strided_slice %37 {offsets = [0, 8], sizes = [16, 8], strides = [1, 1]} : vector<16x96xf32> to vector<16x8xf32>
    %61 = vector.extract_strided_slice %37 {offsets = [0, 40], sizes = [16, 8], strides = [1, 1]} : vector<16x96xf32> to vector<16x8xf32>
    %62 = vector.extract_strided_slice %37 {offsets = [0, 72], sizes = [16, 8], strides = [1, 1]} : vector<16x96xf32> to vector<16x8xf32>
    %63 = arith.truncf %60 : vector<16x8xf32> to vector<16x8xbf16>
    %64 = arith.truncf %61 : vector<16x8xf32> to vector<16x8xbf16>
    %cst_17 = arith.constant dense<0.000000e+00> : vector<16x16xf32>
    %65 = tpu.matmul %63, %64, %cst_17 {dimension_numbers = #tpu.dot_dimension_numbers<[1], [1], [0], [0], [0, 0, 1, 0], [], []>} : vector<16x8xbf16>, vector<16x8xbf16>, vector<16x16xf32> -> vector<16x16xf32>
    %cst_18 = arith.constant 0.353553385 : f32
    %66 = vector.broadcast %cst_18 : f32 to vector<16x16xf32>
    %67 = arith.mulf %65, %66 : vector<16x16xf32>
    %68 = arith.addf %67, %10 : vector<16x16xf32>
    %cst_19 = arith.constant dense<0xFF800000> : vector<16xf32>
    %69 = vector.multi_reduction <maximumf>, %68, %cst_19 [1] : vector<16x16xf32> to vector<16xf32>
    %70 = vector.shape_cast %69 : vector<16xf32> to vector<16x1xf32>
    %71 = vector.broadcast %70 : vector<16x1xf32> to vector<16x16xf32>
    %72 = arith.subf %68, %71 : vector<16x16xf32>
    %73 = math.exp %72 : vector<16x16xf32>
    %cst_20 = arith.constant dense<0.000000e+00> : vector<16xf32>
    %74 = vector.multi_reduction <add>, %73, %cst_20 [1] : vector<16x16xf32> to vector<16xf32>
    %75 = vector.shape_cast %74 : vector<16xf32> to vector<16x1xf32>
    %76 = tpu.reciprocal %75 {approx = true} : vector<16x1xf32> -> vector<16x1xf32>
    %77 = vector.broadcast %76 : vector<16x1xf32> to vector<16x16xf32>
    %78 = arith.mulf %73, %77 : vector<16x16xf32>
    %79 = arith.truncf %78 : vector<16x16xf32> to vector<16x16xbf16>
    %80 = arith.truncf %62 : vector<16x8xf32> to vector<16x8xbf16>
    %cst_21 = arith.constant dense<0.000000e+00> : vector<16x8xf32>
    %81 = tpu.matmul %79, %80, %cst_21 {dimension_numbers = #tpu.dot_dimension_numbers<[1], [0], [0], [1], [0, 0, 1, 1], [], []>} : vector<16x16xbf16>, vector<16x8xbf16>, vector<16x8xf32> -> vector<16x8xf32>
    %82 = vector.extract_strided_slice %37 {offsets = [0, 16], sizes = [16, 8], strides = [1, 1]} : vector<16x96xf32> to vector<16x8xf32>
    %83 = vector.extract_strided_slice %37 {offsets = [0, 48], sizes = [16, 8], strides = [1, 1]} : vector<16x96xf32> to vector<16x8xf32>
    %84 = vector.extract_strided_slice %37 {offsets = [0, 80], sizes = [16, 8], strides = [1, 1]} : vector<16x96xf32> to vector<16x8xf32>
    %85 = arith.truncf %82 : vector<16x8xf32> to vector<16x8xbf16>
    %86 = arith.truncf %83 : vector<16x8xf32> to vector<16x8xbf16>
    %cst_22 = arith.constant dense<0.000000e+00> : vector<16x16xf32>
    %87 = tpu.matmul %85, %86, %cst_22 {dimension_numbers = #tpu.dot_dimension_numbers<[1], [1], [0], [0], [0, 0, 1, 0], [], []>} : vector<16x8xbf16>, vector<16x8xbf16>, vector<16x16xf32> -> vector<16x16xf32>
    %cst_23 = arith.constant 0.353553385 : f32
    %88 = vector.broadcast %cst_23 : f32 to vector<16x16xf32>
    %89 = arith.mulf %87, %88 : vector<16x16xf32>
    %90 = arith.addf %89, %10 : vector<16x16xf32>
    %cst_24 = arith.constant dense<0xFF800000> : vector<16xf32>
    %91 = vector.multi_reduction <maximumf>, %90, %cst_24 [1] : vector<16x16xf32> to vector<16xf32>
    %92 = vector.shape_cast %91 : vector<16xf32> to vector<16x1xf32>
    %93 = vector.broadcast %92 : vector<16x1xf32> to vector<16x16xf32>
    %94 = arith.subf %90, %93 : vector<16x16xf32>
    %95 = math.exp %94 : vector<16x16xf32>
    %cst_25 = arith.constant dense<0.000000e+00> : vector<16xf32>
    %96 = vector.multi_reduction <add>, %95, %cst_25 [1] : vector<16x16xf32> to vector<16xf32>
    %97 = vector.shape_cast %96 : vector<16xf32> to vector<16x1xf32>
    %98 = tpu.reciprocal %97 {approx = true} : vector<16x1xf32> -> vector<16x1xf32>
    %99 = vector.broadcast %98 : vector<16x1xf32> to vector<16x16xf32>
    %100 = arith.mulf %95, %99 : vector<16x16xf32>
    %101 = arith.truncf %100 : vector<16x16xf32> to vector<16x16xbf16>
    %102 = arith.truncf %84 : vector<16x8xf32> to vector<16x8xbf16>
    %cst_26 = arith.constant dense<0.000000e+00> : vector<16x8xf32>
    %103 = tpu.matmul %101, %102, %cst_26 {dimension_numbers = #tpu.dot_dimension_numbers<[1], [0], [0], [1], [0, 0, 1, 1], [], []>} : vector<16x16xbf16>, vector<16x8xbf16>, vector<16x8xf32> -> vector<16x8xf32>
    %104 = vector.extract_strided_slice %37 {offsets = [0, 24], sizes = [16, 8], strides = [1, 1]} : vector<16x96xf32> to vector<16x8xf32>
    %105 = vector.extract_strided_slice %37 {offsets = [0, 56], sizes = [16, 8], strides = [1, 1]} : vector<16x96xf32> to vector<16x8xf32>
    %106 = vector.extract_strided_slice %37 {offsets = [0, 88], sizes = [16, 8], strides = [1, 1]} : vector<16x96xf32> to vector<16x8xf32>
    %107 = arith.truncf %104 : vector<16x8xf32> to vector<16x8xbf16>
    %108 = arith.truncf %105 : vector<16x8xf32> to vector<16x8xbf16>
    %cst_27 = arith.constant dense<0.000000e+00> : vector<16x16xf32>
    %109 = tpu.matmul %107, %108, %cst_27 {dimension_numbers = #tpu.dot_dimension_numbers<[1], [1], [0], [0], [0, 0, 1, 0], [], []>} : vector<16x8xbf16>, vector<16x8xbf16>, vector<16x16xf32> -> vector<16x16xf32>
    %cst_28 = arith.constant 0.353553385 : f32
    %110 = vector.broadcast %cst_28 : f32 to vector<16x16xf32>
    %111 = arith.mulf %109, %110 : vector<16x16xf32>
    %112 = arith.addf %111, %10 : vector<16x16xf32>
    %cst_29 = arith.constant dense<0xFF800000> : vector<16xf32>
    %113 = vector.multi_reduction <maximumf>, %112, %cst_29 [1] : vector<16x16xf32> to vector<16xf32>
    %114 = vector.shape_cast %113 : vector<16xf32> to vector<16x1xf32>
    %115 = vector.broadcast %114 : vector<16x1xf32> to vector<16x16xf32>
    %116 = arith.subf %112, %115 : vector<16x16xf32>
    %117 = math.exp %116 : vector<16x16xf32>
    %cst_30 = arith.constant dense<0.000000e+00> : vector<16xf32>
    %118 = vector.multi_reduction <add>, %117, %cst_30 [1] : vector<16x16xf32> to vector<16xf32>
    %119 = vector.shape_cast %118 : vector<16xf32> to vector<16x1xf32>
    %120 = tpu.reciprocal %119 {approx = true} : vector<16x1xf32> -> vector<16x1xf32>
    %121 = vector.broadcast %120 : vector<16x1xf32> to vector<16x16xf32>
    %122 = arith.mulf %117, %121 : vector<16x16xf32>
    %123 = arith.truncf %122 : vector<16x16xf32> to vector<16x16xbf16>
    %124 = arith.truncf %106 : vector<16x8xf32> to vector<16x8xbf16>
    %cst_31 = arith.constant dense<0.000000e+00> : vector<16x8xf32>
    %125 = tpu.matmul %123, %124, %cst_31 {dimension_numbers = #tpu.dot_dimension_numbers<[1], [0], [0], [1], [0, 0, 1, 1], [], []>} : vector<16x16xbf16>, vector<16x8xbf16>, vector<16x8xf32> -> vector<16x8xf32>
    %126 = tpu.concatenate %59, %81, %103, %125 in 1 : vector<16x8xf32>, vector<16x8xf32>, vector<16x8xf32>, vector<16x8xf32> -> vector<16x32xf32>
    %127 = arith.truncf %126 : vector<16x32xf32> to vector<16x32xbf16>
    %c0_32 = arith.constant 0 : index
    %c0_33 = arith.constant 0 : index
    %128 = vector.load %arg3[%c0_32, %c0_33] : memref<32x32xbf16, #tpu.memory_space<vmem>>, vector<32x32xbf16>
    %cst_34 = arith.constant dense<0.000000e+00> : vector<16x32xf32>
    %129 = tpu.matmul %127, %128, %cst_34 {dimension_numbers = #tpu.dot_dimension_numbers<[1], [0], [0], [1], [0, 0, 1, 1], [], []>} : vector<16x32xbf16>, vector<32x32xbf16>, vector<16x32xf32> -> vector<16x32xf32>
    %130 = vector.broadcast %6 : vector<1x32xf32> to vector<16x32xf32>
    %131 = arith.addf %129, %130 : vector<16x32xf32>
    %132 = arith.addf %0, %131 : vector<16x32xf32>
    %cst_35 = arith.constant dense<0.000000e+00> : vector<16xf32>
    %133 = vector.multi_reduction <add>, %132, %cst_35 [1] : vector<16x32xf32> to vector<16xf32>
    %134 = vector.shape_cast %133 : vector<16xf32> to vector<16x1xf32>
    %cst_36 = arith.constant 3.200000e+01 : f32
    %135 = vector.broadcast %cst_36 : f32 to vector<16x1xf32>
    %136 = arith.divf %134, %135 : vector<16x1xf32>
    %137 = vector.broadcast %136 : vector<16x1xf32> to vector<16x32xf32>
    %138 = arith.subf %132, %137 : vector<16x32xf32>
    %139 = arith.mulf %138, %138 : vector<16x32xf32>
    %cst_37 = arith.constant dense<0.000000e+00> : vector<16xf32>
    %140 = vector.multi_reduction <add>, %139, %cst_37 [1] : vector<16x32xf32> to vector<16xf32>
    %141 = vector.shape_cast %140 : vector<16xf32> to vector<16x1xf32>
    %cst_38 = arith.constant 3.200000e+01 : f32
    %142 = vector.broadcast %cst_38 : f32 to vector<16x1xf32>
    %143 = arith.divf %141, %142 : vector<16x1xf32>
    %144 = vector.broadcast %136 : vector<16x1xf32> to vector<16x32xf32>
    %145 = arith.subf %132, %144 : vector<16x32xf32>
    %cst_39 = arith.constant 9.99999974E-6 : f32
    %146 = vector.broadcast %cst_39 : f32 to vector<16x1xf32>
    %147 = arith.addf %143, %146 : vector<16x1xf32>
    %148 = math.rsqrt %147 : vector<16x1xf32>
    %149 = vector.broadcast %148 : vector<16x1xf32> to vector<16x32xf32>
    %150 = arith.mulf %145, %149 : vector<16x32xf32>
    %151 = vector.broadcast %4 : vector<1x32xf32> to vector<16x32xf32>
    %152 = arith.mulf %150, %151 : vector<16x32xf32>
    %153 = vector.broadcast %5 : vector<1x32xf32> to vector<16x32xf32>
    %154 = arith.addf %152, %153 : vector<16x32xf32>
    %155 = arith.truncf %154 : vector<16x32xf32> to vector<16x32xbf16>
    %c0_40 = arith.constant 0 : index
    %c0_41 = arith.constant 0 : index
    %156 = vector.load %arg4[%c0_40, %c0_41] : memref<32x128xbf16, #tpu.memory_space<vmem>>, vector<32x128xbf16>
    %cst_42 = arith.constant dense<0.000000e+00> : vector<16x128xf32>
    %157 = tpu.matmul %155, %156, %cst_42 {dimension_numbers = #tpu.dot_dimension_numbers<[1], [0], [0], [1], [0, 0, 1, 1], [], []>} : vector<16x32xbf16>, vector<32x128xbf16>, vector<16x128xf32> -> vector<16x128xf32>
    %158 = vector.broadcast %8 : vector<1x128xf32> to vector<16x128xf32>
    %159 = arith.addf %157, %158 : vector<16x128xf32>
    %cst_43 = arith.constant 5.000000e-01 : f32
    %160 = vector.broadcast %cst_43 : f32 to vector<16x128xf32>
    %161 = arith.mulf %160, %159 : vector<16x128xf32>
    %cst_44 = arith.constant 4.471500e-02 : f32
    %162 = vector.broadcast %cst_44 : f32 to vector<16x128xf32>
    %163 = arith.mulf %162, %159 : vector<16x128xf32>
    %164 = arith.mulf %163, %159 : vector<16x128xf32>
    %165 = arith.mulf %164, %159 : vector<16x128xf32>
    %166 = arith.addf %159, %165 : vector<16x128xf32>
    %cst_45 = arith.constant 0.797884583 : f32
    %167 = vector.broadcast %cst_45 : f32 to vector<16x128xf32>
    %168 = arith.mulf %167, %166 : vector<16x128xf32>
    %169 = math.tanh %168 : vector<16x128xf32>
    %cst_46 = arith.constant 1.000000e+00 : f32
    %170 = vector.broadcast %cst_46 : f32 to vector<16x128xf32>
    %171 = arith.addf %170, %169 : vector<16x128xf32>
    %172 = arith.mulf %161, %171 : vector<16x128xf32>
    %173 = arith.truncf %172 : vector<16x128xf32> to vector<16x128xbf16>
    %c0_47 = arith.constant 0 : index
    %c0_48 = arith.constant 0 : index
    %174 = vector.load %arg5[%c0_47, %c0_48] : memref<128x32xbf16, #tpu.memory_space<vmem>>, vector<128x32xbf16>
    %cst_49 = arith.constant dense<0.000000e+00> : vector<16x32xf32>
    %175 = tpu.matmul %173, %174, %cst_49 {dimension_numbers = #tpu.dot_dimension_numbers<[1], [0], [0], [1], [0, 0, 1, 1], [], []>} : vector<16x128xbf16>, vector<128x32xbf16>, vector<16x32xf32> -> vector<16x32xf32>
    %176 = vector.broadcast %7 : vector<1x32xf32> to vector<16x32xf32>
    %177 = arith.addf %175, %176 : vector<16x32xf32>
    %178 = arith.addf %132, %177 : vector<16x32xf32>
    %c0_50 = arith.constant 0 : index
    %c0_51 = arith.constant 0 : index
    %179 = vector.load %arg8[%c0_50, %c0_51] : memref<16x32xf32, #tpu.memory_space<vmem>>, vector<16x32xf32>
    tpu.vector_store %arg8[%c0_50, %c0_51], %178 {strides = array<i32>} : memref<16x32xf32, #tpu.memory_space<vmem>>, vector<16x32xf32>,
    return
  }
  func.func @transform_0(%arg0: i32) -> (i32, i32) {
    %c0_i32 = arith.constant 0 : i32
    %c0_i32_0 = arith.constant 0 : i32
    return %arg0, %c0_i32 : i32, i32
  }
  func.func @transform_1(%arg0: i32) -> (i32, i32) {
    %c0_i32 = arith.constant 0 : i32
    %c0_i32_0 = arith.constant 0 : i32
    %c0_i32_1 = arith.constant 0 : i32
    return %c0_i32, %c0_i32_0 : i32, i32
  }
  func.func @transform_2(%arg0: i32) -> (i32, i32) {
    %c0_i32 = arith.constant 0 : i32
    %c0_i32_0 = arith.constant 0 : i32
    %c0_i32_1 = arith.constant 0 : i32
    return %c0_i32, %c0_i32_0 : i32, i32
  }
  func.func @transform_3(%arg0: i32) -> (i32, i32) {
    %c0_i32 = arith.constant 0 : i32
    %c0_i32_0 = arith.constant 0 : i32
    %c0_i32_1 = arith.constant 0 : i32
    return %c0_i32, %c0_i32_0 : i32, i32
  }
  func.func @transform_4(%arg0: i32) -> (i32, i32) {
    %c0_i32 = arith.constant 0 : i32
    %c0_i32_0 = arith.constant 0 : i32
    %c0_i32_1 = arith.constant 0 : i32
    return %c0_i32, %c0_i32_0 : i32, i32
  }
  func.func @transform_5(%arg0: i32) -> (i32, i32) {
    %c0_i32 = arith.constant 0 : i32
    %c0_i32_0 = arith.constant 0 : i32
    %c0_i32_1 = arith.constant 0 : i32
    return %c0_i32, %c0_i32_0 : i32, i32
  }
  func.func @transform_6(%arg0: i32) -> (i32, i32) {
    %c0_i32 = arith.constant 0 : i32
    %c0_i32_0 = arith.constant 0 : i32
    %c0_i32_1 = arith.constant 0 : i32
    return %c0_i32, %c0_i32_0 : i32, i32
  }
  func.func @transform_7(%arg0: i32) -> (i32, i32) {
    %c0_i32 = arith.constant 0 : i32
    %c0_i32_0 = arith.constant 0 : i32
    return %arg0, %c0_i32 : i32, i32
  }
}

</mosaic_0001>

<bundles_post_ra>
// kernel: tpu_custom_call.1
= control target key start
LH: loop header
LB: loop body
LE: loop exit
PB: predicated region body
PF: predicated region fallthrough
CT: control target
= control target key end

     0   :  { %vm33_vm0 = vcmask 261120   ;;  %s1529_s0 = inlined_call_operand.vmem [shape: f32[16,32], index: 0, kind: input, shape index: {}]   ;;  %s1530_s1 = inlined_call_operand.vmem [shape: bf16[32,96], index: 1, kind: input, shape index: {}]   ;;  %s1531_s2 = inlined_call_operand.vmem [shape: bf16[32,32], index: 2, kind: input, shape index: {}]   ;;  %s1532_s3 = inlined_call_operand.vmem [shape: bf16[32,128], index: 3, kind: input, shape index: {}]   ;;  %s1533_s4 = inlined_call_operand.vmem [shape: bf16[128,32], index: 4, kind: input, shape index: {}]   ;;  %s1534_s5 = inlined_call_operand.vmem [shape: f32[8,128], index: 5, kind: input, shape index: {}]   ;;  %s1535_s6 = inlined_call_operand.vmem [shape: f32[16,16], index: 6, kind: input, shape index: {}]   ;;  %s1536_s7 = inlined_call_operand.hbm [shape: f32[16,32], index: 7, kind: output, shape index: {}]  }
   0x1   :  { %v1316_v0 = vld [vmem:[%s1529_s0] sm:$0xff]  ;;  %v1321_v1 = vld [vmem:[%s1529_s0 + $0x8] sm:$0xff] }
   0x2   :  { %v34_v2 = vsel %vm33_vm0, %v1316_v0, 0.0  ;;  %v37_v3 = vsel %vm33_vm0, %v1321_v1, 0.0 }
   0x3   :  { %35 = vadd.xlane.f32.xlu0 %v34_v2 }
   0x7   :  { %38 = vadd.xlane.f32.xlu0 %v37_v3 }
   0x8   :  { %12 = vsyncpa [#allocation3], 0  ;;  %v1173_v14 = vld [vmem:[%s1530_s1] sm:$0xff]   ;;  %v1255_v15 = vmov 0.0   ;;  %v1174_v16 = vld [vmem:[%s1530_s1 + $0x8] sm:$0xff]   ;;  %vm1256_vm1 = vmmov 0   ;;  %v61_v21 = vlaneseq }
   0x9   :  { %1048 = vmatprep.subr.bf16.mxu0 %v1255_v15  ;;  %1068 = vmatprep.subr.bf16.mxu1 %v1255_v15  ;;  %v1351_v26 = vld [vmem:[%s1534_s5] sm:$0xff]  ;;  %s1257_s5 = smov 88   ;;  %s1258_s9 = smov 96   ;;  %vm142_vm2 = vcmask 64512   ;;  %vm194_vm3 = vcmask 130048   ;;  %vm668_vm4 = vcmask 195584  }
   0xa   :  { %1049 = vmatpush3.bf16.msra.mxu0 %v1173_v14  ;;  %1052 = vmatprep.mubr.msk.bf16.mxu0 %vm1256_vm1, %v1255_v15  ;;  %v1345_v24 = vshrl.u32 %v61_v21, 7  ;;  %s1259_s10 = smov 120   ;;  %s1260_s11 = smov 112   ;;  %v31_v61 = vld [vmem:[%s1535_s6] sm:$0xff] }
   0xb   :  { %1050 = vmatprep.subr.bf16.mxu0 %v1255_v15  ;;  %1070 = vmatprep.mubr.msk.bf16.mxu1 %vm1256_vm1, %v1255_v15  ;;  %s1261_s12 = smov 80   ;;  %s1262_s13 = smov 104  }
   0xc   :  { %v63_v25 = vsub.s32 0, %v1345_v24  ;;  %v69_v30 = vsub.s32 1, %v1345_v24  ;;  %v80_v39 = vsub.s32 7, %v1345_v24  ;;  %s1263_s14 = smov 72   ;;  %s1265_s19 = smov 48  }
   0xd   :  { %s1266_s20 = smov 40   ;;  %s1267_s21 = smov 56  }
   0xe   :  { %1051 = vmatpush3.bf16.msra.mxu0 %v1174_v16  ;;  %v64_v29 = vrot.slane %v1351_v26, %v63_v25  ;;  %v70_v34 = vrot.slane %v1351_v26, %v69_v30  ;;  %v81_v40 = vrot.slane %v1351_v26, %v80_v39  ;;  %s1268_s24 = smov 8   ;;  %s1269_s27 = smov 16  }
   0xf   :  { %1056 = vmatprep.subr.bf16.mxu0 %v1255_v15  ;;  %s1270_s0 = smov 24  }
  0x90   :  { %v36_v4 = vpop.xlane.xlu0 %35 }
  0x91   :  { %v41_v5 = vmul.f32 0.03125, %v36_v4 }
  0x93   :  { %v43_v6 = vsub.f32 %v1316_v0, %v41_v5  ;;  %v32_v5 = vld [vmem:[%s1535_s6 + $0x8] sm:$0xff]  ;;  %s1264_s6 = smov 64  }
  0x94   :  { %v39_v7 = vpop.xlane.xlu0 %38 }
  0x95   :  { %v42_v8 = vmul.f32 0.03125, %v39_v7  ;;  %v45_v9 = vmul.f32 %v43_v6, %v43_v6 }
  0x97   :  { %v44_v10 = vsub.f32 %v1321_v1, %v42_v8  ;;  %v47_v11 = vsel %vm33_vm0, %v45_v9, 0.0 }
  0x98   :  { %48 = vadd.xlane.f32.xlu1 %v47_v11 }
  0x99   :  { %v46_v12 = vmul.f32 %v44_v10, %v44_v10 }
  0x9b   :  { %v50_v13 = vsel %vm33_vm0, %v46_v12, 0.0 }
  0x9c   :  { %51 = vadd.xlane.f32.xlu1 %v50_v13 }
 0x125   :  { %v49_v17 = vpop.xlane.xlu1 %48 }
 0x126   :  { %v53_v18 = vmul.f32 0.03125, %v49_v17 }
 0x128   :  { %v55_v19 = vadd.f32 1e-05, %v53_v18 }
 0x129   :  { %v52_v20 = vpop.xlane.xlu1 %51 }
 0x12a   :  { %1187 = vrsqrt.f32 %v55_v19  ;;  %v54_v22 = vmul.f32 0.03125, %v52_v20 }
 0x12c   :  { %v56_v23 = vadd.f32 1e-05, %v54_v22 }
 0x12e   :  { %1189 = vrsqrt.f32 %v56_v23 }
 0x134   :  { %v1188_v27 = vpop.eup %1187 }
 0x135   :  { %v59_v28 = vmul.f32 %v1188_v27, %v43_v6 }
 0x137   :  { %v65_v33 = vmul.f32 %v64_v29, %v59_v28 }
 0x138   :  { %v1190_v31 = vpop.eup %1189 }
 0x139   :  { %v60_v32 = vmul.f32 %v1190_v31, %v44_v10  ;;  %v71_v36 = vadd.f32 %v70_v34, %v65_v33 }
 0x13b   :  { %v66_v35 = vmul.f32 %v64_v29, %v60_v32 }
 0x13d   :  { %v72_v37 = vadd.f32 %v70_v34, %v66_v35 }
 0x13f   :  { %v73_v38 = vpack.c.bf16 %v72_v37, %v71_v36 }
 0x141   :  { %1053 = vmatmul.mubr.msk.bf16.vlgmr.msra.gmra.mrb[0].mxu0 %vm33_vm0, %v73_v38 }
 0x142   :  { %1058 = vmatprep.mubr.msk.bf16.mxu0 %vm1256_vm1, %v1255_v15 }
 0x214   :  { %v131_v41 = vpop.f32.mrb[0].mxu0 }
 0x215   :  { %v1054_v42 = vpop.f32.mrb[1].mxu0  ;;  %v132_v44 = vadd.f32 %v131_v41, %v81_v40 }
 0x216   :  { %v134_v43 = vpop.f32.mrb[2].mxu0 }
 0x217   :  { %v135_v45 = vadd.f32 %v134_v43, %v81_v40  ;;  %v1055_v46 = vpop.f32.mrb[3].mxu0 }
 0x219   :  { %v1361_v47 = vpack.c.bf16 %v135_v45, %v132_v44 }
 0x21b   :  { %267 = vrot.lane.b32.xlu1 %v1361_v47, %s1257_s5  ;;  %140 = vrot.lane.b32.xlu0 %v1361_v47, %s1258_s9 }
 0x21f   :  { %265 = vrot.lane.b32.xlu1 %v1361_v47, %s1259_s10  ;;  %390 = vrot.lane.b32.xlu0 %v1361_v47, %s1260_s11 }
 0x223   :  { %392 = vrot.lane.b32.xlu1 %v1361_v47, %s1261_s12  ;;  %515 = vrot.lane.b32.xlu0 %v1361_v47, %s1262_s13 }
 0x227   :  { %517 = vrot.lane.b32.xlu1 %v1361_v47, %s1263_s14 }
 0x28d   :  { %v268_v48 = vpop.permute.xlu1 %267  ;;  %v141_v49 = vpop.permute.xlu0 %140 }
 0x28e   :  { %v147_v50 = vsel %vm142_vm2, %v141_v49, 0  ;;  %v273_v51 = vsel %vm142_vm2, %v268_v48, 0 }
 0x28f   :  { %1057 = vmatpush3.bf16.xpose.msra.mxu0 %v147_v50  ;;  %1069 = vmatpush3.bf16.xpose.msra.mxu1 %v273_v51 }
 0x290   :  { %1080 = vmatprep.subr.bf16.mxu1 %v1255_v15  ;;  %1062 = vmatprep.subr.bf16.mxu0 %v1255_v15 }
 0x291   :  { %v266_v52 = vpop.permute.xlu1 %265  ;;  %v391_v56 = vpop.permute.xlu0 %390 }
 0x295   :  { %v393_v53 = vpop.permute.xlu1 %392  ;;  %v516_v58 = vpop.permute.xlu0 %515 }
 0x296   :  { %v398_v54 = vsel %vm142_vm2, %v393_v53, 0  ;;  %1059 = vmatmul.mubr.msk.bf16.vlgmr.msra.gmra.mrb[4].mxu0 %vm142_vm2, %v1361_v47  ;;  %1071 = vmatmul.mubr.msk.bf16.vlgmr.msra.gmra.mrb[0].mxu1 %vm142_vm2, %v266_v52 }
 0x297   :  { %1081 = vmatpush3.bf16.xpose.msra.mxu1 %v398_v54  ;;  %1082 = vmatprep.mubr.msk.bf16.mxu1 %vm1256_vm1, %v1255_v15 }
 0x298   :  { %1092 = vmatprep.subr.bf16.mxu1 %v1255_v15  ;;  %1064 = vmatprep.mubr.msk.bf16.mxu0 %vm1256_vm1, %v1255_v15 }
 0x299   :  { %v518_v55 = vpop.permute.xlu1 %517 }
 0x29a   :  { %v523_v57 = vsel %vm142_vm2, %v518_v55, 0 }
 0x29e   :  { %1083 = vmatmul.mubr.msk.bf16.vlgmr.msra.gmra.mrb[4].mxu1 %vm142_vm2, %v391_v56 }
 0x29f   :  { %1093 = vmatpush3.bf16.xpose.msra.mxu1 %v523_v57  ;;  %1094 = vmatprep.mubr.msk.bf16.mxu1 %vm1256_vm1, %v1255_v15 }
 0x2a0   :  { %1104 = vmatprep.subr.bf16.mxu1 %v1255_v15 }
 0x2a6   :  { %1095 = vmatmul.mubr.msk.bf16.vlgmr.msra.gmra.mrb[8].mxu1 %vm142_vm2, %v516_v58 }
 0x2a7   :  { %1108 = vmatprep.mubr.msk.bf16.mxu1 %vm1256_vm1, %v1255_v15 }
 0x369   :  { %v183_v59 = vpop.f32.mrb[4].mxu0  ;;  %v309_v60 = vpop.f32.mrb[0].mxu1 }
 0x36a   :  { %v190_v62 = vmul.f32 0.35355338, %v183_v59  ;;  %v1060_v63 = vpop.f32.mrb[5].mxu0  ;;  %v1072_v2 = vpop.f32.mrb[1].mxu1  ;;  %v316_v6 = vmul.f32 0.35355338, %v309_v60 }
 0x36b   :  { %v186_v3 = vpop.f32.mrb[6].mxu0  ;;  %v312_v4 = vpop.f32.mrb[2].mxu1 }
 0x36c   :  { %v191_v7 = vmul.f32 0.35355338, %v186_v3  ;;  %v1061_v8 = vpop.f32.mrb[7].mxu0  ;;  %v1073_v9 = vpop.f32.mrb[3].mxu1  ;;  %v192_v10 = vadd.f32 %v190_v62, %v31_v61  ;;  %v317_v13 = vmul.f32 0.35355338, %v312_v4  ;;  %v318_v16 = vadd.f32 %v316_v6, %v31_v61 }
 0x36e   :  { %v195_v11 = vsel %vm194_vm3, %v192_v10, -inf  ;;  %v193_v12 = vadd.f32 %v191_v7, %v32_v5  ;;  %v320_v23 = vsel %vm194_vm3, %v318_v16, -inf  ;;  %v319_v27 = vadd.f32 %v317_v13, %v32_v5 }
 0x36f   :  { %196 = vmax.xlane.f32.xlu1 %v195_v11 }
 0x370   :  { %v198_v14 = vsel %vm194_vm3, %v193_v12, -inf  ;;  %v323_v29 = vsel %vm194_vm3, %v319_v27, -inf }
 0x371   :  { %v434_v17 = vpop.f32.mrb[4].mxu1  ;;  %199 = vmax.xlane.f32.xlu0 %v198_v14 }
 0x372   :  { %v441_v18 = vmul.f32 0.35355338, %v434_v17  ;;  %v1084_v19 = vpop.f32.mrb[5].mxu1 }
 0x373   :  { %v437_v20 = vpop.f32.mrb[6].mxu1 }
 0x374   :  { %v442_v21 = vmul.f32 0.35355338, %v437_v20  ;;  %v1085_v22 = vpop.f32.mrb[7].mxu1  ;;  %v443_v25 = vadd.f32 %v441_v18, %v31_v61 }
 0x375   :  { %321 = vmax.xlane.f32.xlu0 %v320_v23 }
 0x376   :  { %v445_v28 = vsel %vm194_vm3, %v443_v25, -inf  ;;  %v444_v30 = vadd.f32 %v442_v21, %v32_v5 }
 0x377   :  { %446 = vmax.xlane.f32.xlu1 %v445_v28 }
 0x378   :  { %v448_v37 = vsel %vm194_vm3, %v444_v30, -inf }
 0x379   :  { %v559_v31 = vpop.f32.mrb[8].mxu1  ;;  %324 = vmax.xlane.f32.xlu0 %v323_v29 }
 0x37a   :  { %v566_v32 = vmul.f32 0.35355338, %v559_v31  ;;  %v1096_v33 = vpop.f32.mrb[9].mxu1 }
 0x37b   :  { %v562_v34 = vpop.f32.mrb[10].mxu1 }
 0x37c   :  { %v567_v35 = vmul.f32 0.35355338, %v562_v34  ;;  %v1097_v36 = vpop.f32.mrb[11].mxu1  ;;  %v568_v38 = vadd.f32 %v566_v32, %v31_v61 }
 0x37d   :  { %449 = vmax.xlane.f32.xlu0 %v448_v37 }
 0x37e   :  { %v570_v39 = vsel %vm194_vm3, %v568_v38, -inf  ;;  %v569_v40 = vadd.f32 %v567_v35, %v32_v5 }
 0x37f   :  { %571 = vmax.xlane.f32.xlu1 %v570_v39 }
 0x380   :  { %v573_v41 = vsel %vm194_vm3, %v569_v40, -inf }
 0x381   :  { %574 = vmax.xlane.f32.xlu0 %v573_v41 }
 0x390   :  { %218 = vrot.lane.b32.xlu1 %v1361_v47, %s1264_s6 }
 0x3fc   :  { %v197_v42 = vpop.xlane.xlu1 %196 }
 0x3fd   :  { %v201_v43 = vsub.f32 %v192_v10, %v197_v42 }
 0x3fe   :  { %v200_v44 = vpop.xlane.xlu0 %199 }
 0x3ff   :  { %v203_v45 = vmul.f32 1.442695, %v201_v43  ;;  %v202_v46 = vsub.f32 %v193_v12, %v200_v44 }
 0x401   :  { %1191 = vpow2.f32 %v203_v45  ;;  %v205_v48 = vmul.f32 1.442695, %v202_v46 }
 0x402   :  { %v322_v49 = vpop.xlane.xlu0 %321 }
 0x403   :  { %1193 = vpow2.f32 %v205_v48  ;;  %v326_v50 = vsub.f32 %v318_v16, %v322_v49 }
 0x404   :  { %v447_v51 = vpop.xlane.xlu1 %446 }
 0x405   :  { %v328_v52 = vmul.f32 1.442695, %v326_v50  ;;  %v451_v53 = vsub.f32 %v443_v25, %v447_v51 }
 0x406   :  { %v325_v54 = vpop.xlane.xlu0 %324 }
 0x407   :  { %1195 = vpow2.f32 %v328_v52  ;;  %v453_v55 = vmul.f32 1.442695, %v451_v53  ;;  %v327_v56 = vsub.f32 %v319_v27, %v325_v54 }
 0x409   :  { %1197 = vpow2.f32 %v453_v55  ;;  %v330_v57 = vmul.f32 1.442695, %v327_v56 }
 0x40a   :  { %v450_v58 = vpop.xlane.xlu0 %449 }
 0x40b   :  { %v1192_v59 = vpop.eup %1191  ;;  %1199 = vpow2.f32 %v330_v57  ;;  %v452_v60 = vsub.f32 %v444_v30, %v450_v58 }
 0x40c   :  { %v572_v61 = vpop.xlane.xlu1 %571  ;;  %v207_v62 = vsel %vm194_vm3, %v1192_v59, 0.0 }
 0x40d   :  { %v1194_v63 = vpop.eup %1193  ;;  %v455_v2 = vmul.f32 1.442695, %v452_v60  ;;  %v576_v3 = vsub.f32 %v568_v38, %v572_v61  ;;  %208 = vadd.xlane.f32.xlu1 %v207_v62 }
 0x40e   :  { %v575_v4 = vpop.xlane.xlu0 %574  ;;  %v210_v5 = vsel %vm194_vm3, %v1194_v63, 0.0 }
 0x40f   :  { %1201 = vpow2.f32 %v455_v2  ;;  %v578_v6 = vmul.f32 1.442695, %v576_v3  ;;  %v577_v7 = vsub.f32 %v569_v40, %v575_v4  ;;  %211 = vadd.xlane.f32.xlu0 %v210_v5 }
 0x410   :  { %v219_v8 = vpop.permute.xlu1 %218 }
 0x411   :  { %v1196_v9 = vpop.eup %1195  ;;  %1203 = vpow2.f32 %v578_v6  ;;  %v580_v10 = vmul.f32 1.442695, %v577_v7  ;;  %1063 = vmatpush3.bf16.msra.mxu0 %v219_v8  ;;  %v1176_v6 = vld [vmem:[%s1531_s2 + $0x8] sm:$0xff]  }
 0x412   :  { %v332_v11 = vsel %vm194_vm3, %v1196_v9, 0.0  ;;  %1074 = vmatprep.subr.bf16.mxu0 %v1255_v15 }
 0x413   :  { %v1198_v12 = vpop.eup %1197  ;;  %1205 = vpow2.f32 %v580_v10  ;;  %333 = vadd.xlane.f32.xlu1 %v332_v11 }
 0x414   :  { %v457_v14 = vsel %vm194_vm3, %v1198_v12, 0.0 }
 0x415   :  { %v1200_v13 = vpop.eup %1199 }
 0x416   :  { %v335_v16 = vsel %vm194_vm3, %v1200_v13, 0.0 }
 0x417   :  { %458 = vadd.xlane.f32.xlu1 %v457_v14  ;;  %336 = vadd.xlane.f32.xlu0 %v335_v16 }
 0x419   :  { %v1202_v17 = vpop.eup %1201 }
 0x41a   :  { %v460_v18 = vsel %vm194_vm3, %v1202_v17, 0.0 }
 0x41b   :  { %v1204_v19 = vpop.eup %1203  ;;  %461 = vadd.xlane.f32.xlu0 %v460_v18 }
 0x41c   :  { %v582_v20 = vsel %vm194_vm3, %v1204_v19, 0.0 }
 0x41d   :  { %v1206_v21 = vpop.eup %1205  ;;  %583 = vadd.xlane.f32.xlu1 %v582_v20 }
 0x41e   :  { %v585_v22 = vsel %vm194_vm3, %v1206_v21, 0.0 }
 0x41f   :  { %586 = vadd.xlane.f32.xlu0 %v585_v22 }
 0x42e   :  { %468 = vrot.lane.b32.xlu1 %v1361_v47, %s1265_s19 }
 0x432   :  { %593 = vrot.lane.b32.xlu1 %v1361_v47, %s1266_s20 }
 0x435   :  { %343 = vrot.lane.b32.xlu0 %v1361_v47, %s1267_s21 }
 0x49a   :  { %v209_v23 = vpop.xlane.xlu1 %208 }
 0x49b   :  { %1207 = vrcp.f32 %v209_v23 }
 0x49c   :  { %v212_v25 = vpop.xlane.xlu0 %211 }
 0x49d   :  { %1209 = vrcp.f32 %v212_v25 }
 0x4a0   :  { %v334_v27 = vpop.xlane.xlu1 %333 }
 0x4a1   :  { %1211 = vrcp.f32 %v334_v27 }
 0x4a4   :  { %v337_v28 = vpop.xlane.xlu0 %336  ;;  %v459_v34 = vpop.xlane.xlu1 %458 }
 0x4a5   :  { %v1208_v29 = vpop.eup %1207  ;;  %1213 = vrcp.f32 %v337_v28 }
 0x4a6   :  { %v215_v31 = vmul.f32 %v1208_v29, %v1192_v59 }
 0x4a7   :  { %v1210_v30 = vpop.eup %1209 }
 0x4a8   :  { %v216_v32 = vmul.f32 %v1210_v30, %v1194_v63  ;;  %v462_v33 = vpop.xlane.xlu0 %461  ;;  %v1175_v63 = vld [vmem:[%s1531_s2] sm:$0xff]  }
 0x4a9   :  { %1215 = vrcp.f32 %v462_v33  ;;  %1105 = vmatpush3.bf16.msra.mxu1 %v1175_v63 }
 0x4aa   :  { %v217_v35 = vpack.c.bf16 %v216_v32, %v215_v31  ;;  %1217 = vrcp.f32 %v459_v34  ;;  %v584_v37 = vpop.xlane.xlu1 %583  ;;  %1106 = vmatprep.subr.bf16.mxu1 %v1255_v15  ;;  %v678_v34 = vsub.s32 4, %v1345_v24 }
 0x4ab   :  { %v1212_v36 = vpop.eup %1211 }
 0x4ac   :  { %1065 = vmatmul.mubr.msk.bf16.vlgmr.msra.gmra.mrb[8].mxu0 %vm194_vm3, %v217_v35  ;;  %v587_v47 = vpop.xlane.xlu0 %586  ;;  %v340_v40 = vmul.f32 %v1212_v36, %v1196_v9  ;;  %v679_v35 = vrot.slane %v1351_v26, %v678_v34 }
 0x4ad   :  { %1076 = vmatprep.mubr.msk.bf16.mxu0 %vm1256_vm1, %v1255_v15  ;;  %1219 = vrcp.f32 %v587_v47  ;;  %1107 = vmatpush3.bf16.msra.mxu1 %v1176_v6 }
 0x4ae   :  { %1221 = vrcp.f32 %v584_v37  ;;  %v469_v44 = vpop.permute.xlu1 %468  ;;  %1120 = vmatprep.subr.bf16.mxu1 %v1255_v15 }
 0x4af   :  { %v1214_v38 = vpop.eup %1213 }
 0x4b0   :  { %v344_v39 = vpop.permute.xlu0 %343  ;;  %v341_v41 = vmul.f32 %v1214_v38, %v1200_v13 }
 0x4b1   :  { %1075 = vmatpush3.bf16.msra.mxu0 %v344_v39 }
 0x4b2   :  { %1086 = vmatprep.subr.bf16.mxu0 %v1255_v15  ;;  %v342_v42 = vpack.c.bf16 %v341_v41, %v340_v40  ;;  %v594_v51 = vpop.permute.xlu1 %593 }
 0x4b3   :  { %v1216_v43 = vpop.eup %1215 }
 0x4b4   :  { %1077 = vmatmul.mubr.msk.bf16.vlgmr.msra.gmra.mrb[12].mxu0 %vm194_vm3, %v342_v42  ;;  %v1218_v45 = vpop.eup %1217  ;;  %v466_v46 = vmul.f32 %v1216_v43, %v1202_v17 }
 0x4b5   :  { %1087 = vmatpush3.bf16.msra.mxu0 %v469_v44  ;;  %1088 = vmatprep.mubr.msk.bf16.mxu0 %vm1256_vm1, %v1255_v15  ;;  %v465_v48 = vmul.f32 %v1218_v45, %v1198_v12 }
 0x4b6   :  { %1098 = vmatprep.subr.bf16.mxu0 %v1255_v15 }
 0x4b7   :  { %v467_v49 = vpack.c.bf16 %v466_v46, %v465_v48  ;;  %v1220_v50 = vpop.eup %1219 }
 0x4b8   :  { %v1222_v52 = vpop.eup %1221  ;;  %v591_v53 = vmul.f32 %v1220_v50, %v1206_v21 }
 0x4b9   :  { %v590_v54 = vmul.f32 %v1222_v52, %v1204_v19 }
 0x4bb   :  { %v592_v55 = vpack.c.bf16 %v591_v53, %v590_v54  ;;  %v1177_v54 = vld [vmem:[%s1532_s3] sm:$0xff]  }
 0x4bc   :  { %1089 = vmatmul.mubr.msk.bf16.vlgmr.msra.gmra.mrb[16].mxu0 %vm194_vm3, %v467_v49 }
 0x4bd   :  { %1099 = vmatpush3.bf16.msra.mxu0 %v594_v51  ;;  %1100 = vmatprep.mubr.msk.bf16.mxu0 %vm1256_vm1, %v1255_v15 }
 0x4be   :  { %1112 = vmatprep.subr.bf16.mxu0 %v1255_v15 }
 0x4c4   :  { %1101 = vmatmul.mubr.msk.bf16.vlgmr.msra.gmra.mrb[20].mxu0 %vm194_vm3, %v592_v55  ;;  %v1178_v55 = vld [vmem:[%s1532_s3 + $0x8] sm:$0xff]  }
 0x4c5   :  { %1116 = vmatprep.mubr.msk.bf16.mxu0 %vm1256_vm1, %v1255_v15  ;;  %1113 = vmatpush3.bf16.msra.mxu0 %v1177_v54 }
 0x4c6   :  { %1114 = vmatprep.subr.bf16.mxu0 %v1255_v15 }
 0x4c9   :  { %1115 = vmatpush3.bf16.msra.mxu0 %v1178_v55 }
 0x57f   :  { %v258_v56 = vpop.f32.mrb[8].mxu0 }
 0x580   :  { %v1066_v57 = vpop.f32.mrb[9].mxu0 }
 0x581   :  { %v261_v58 = vpop.f32.mrb[10].mxu0 }
 0x582   :  { %v1067_v59 = vpop.f32.mrb[11].mxu0 }
 0x587   :  { %v383_v60 = vpop.f32.mrb[12].mxu0 }
 0x588   :  { %v1078_v61 = vpop.f32.mrb[13].mxu0 }
 0x589   :  { %v386_v62 = vpop.f32.mrb[14].mxu0 }
 0x58a   :  { %v1158_v2 = vpack.i.bf16 %v386_v62, %v383_v60  ;;  %v1079_v3 = vpop.f32.mrb[15].mxu0  ;;  %v766_v62 = vsub.s32 2, %v1345_v24 }
 0x58c   :  { %1159 = vrot.lane.b32.xlu1 %v1158_v2, %s1268_s24  ;;  %v767_v2 = vrot.slane %v1351_v26, %v766_v62 }
 0x58f   :  { %v508_v4 = vpop.f32.mrb[16].mxu0 }
 0x590   :  { %v1090_v5 = vpop.f32.mrb[17].mxu0 }
 0x591   :  { %v511_v7 = vpop.f32.mrb[18].mxu0 }
 0x592   :  { %v1163_v8 = vpack.i.bf16 %v511_v7, %v508_v4  ;;  %v1091_v9 = vpop.f32.mrb[19].mxu0  ;;  %v772_v4 = vsub.s32 3, %v1345_v24 }
 0x594   :  { %1164 = vrot.lane.b32.xlu0 %v1163_v8, %s1269_s27  ;;  %v773_v8 = vrot.slane %v1351_v26, %v772_v4 }
 0x597   :  { %v633_v10 = vpop.f32.mrb[20].mxu0 }
 0x598   :  { %v1102_v11 = vpop.f32.mrb[21].mxu0 }
 0x599   :  { %v636_v12 = vpop.f32.mrb[22].mxu0 }
 0x59a   :  { %v1168_v13 = vpack.i.bf16 %v636_v12, %v633_v10  ;;  %v1103_v14 = vpop.f32.mrb[23].mxu0 }
 0x59b   :  { %v1180_v14 = vld [vmem:[%s1533_s4 + $0x8] sm:$0xff]  }
 0x59c   :  { %1169 = vrot.lane.b32.xlu1 %v1168_v13, %s1270_s0  ;;  %v1179_v13 = vld [vmem:[%s1533_s4] sm:$0xff]  }
 0x5fe   :  { %v1160_v16 = vpop.permute.xlu1 %1159 }
 0x5ff   :  { %v1162_v18 = vunpack.i.h.bf16 %v1160_v16  ;;  %v1161_v19 = vunpack.i.l.bf16 %v1160_v16  ;;  %v1181_v16 = vld [vmem:[%s1533_s4 + $0x10] sm:$0xff]  }
 0x601   :  { %v665_v23 = vsel %vm142_vm2, %v261_v58, %v1162_v18  ;;  %v664_v25 = vsel %vm142_vm2, %v258_v56, %v1161_v19  ;;  %v1183_v18 = vld [vmem:[%s1533_s4 + $0x20] sm:$0xff]   ;;  %v1184_v19 = vld [vmem:[%s1533_s4 + $0x28] sm:$0xff]  }
 0x606   :  { %v1165_v17 = vpop.permute.xlu0 %1164 }
 0x607   :  { %v1167_v20 = vunpack.i.h.bf16 %v1165_v17  ;;  %v1166_v21 = vunpack.i.l.bf16 %v1165_v17  ;;  %v1182_v17 = vld [vmem:[%s1533_s4 + $0x18] sm:$0xff]  }
 0x609   :  { %v667_v29 = vsel %vm194_vm3, %v665_v23, %v1167_v20  ;;  %v666_v30 = vsel %vm194_vm3, %v664_v25, %v1166_v21  ;;  %v1185_v20 = vld [vmem:[%s1533_s4 + $0x30] sm:$0xff]   ;;  %v1186_v21 = vld [vmem:[%s1533_s4 + $0x38] sm:$0xff]   ;;  %s1271_s4 = smov [#allocation2]  }
 0x60a   :  { %s978_s20 = sshll.u32 %s1271_s4, 4  ;;  %s979_s20 = int_to_ptr.vmem [resolvable:$true] %s978_s20 }
 0x60b   :  { %s1231_s21 = scalar_lea.vmem %s979_s20, 256  ;;  %p1236_p1 = scmp.lt.s32.totalorder %s979_s20, %s979_s20 }
 0x60c   :  { %p1232_p0 = scmp.ne.s32.totalorder %s979_s20, %s1231_s21  ;;  %p1237_p2 = scmp.lt.s32.totalorder %s1231_s21, %s1231_s21 }
 0x60e   :  { %v1170_v22 = vpop.permute.xlu1 %1169  ;;  %p1238_p3 = por %p1237_p2, %p1236_p1 }
 0x60f   :  { %v1172_v27 = vunpack.i.h.bf16 %v1170_v22  ;;  %v1171_v28 = vunpack.i.l.bf16 %v1170_v22  ;;  %v783_v22 = vsub.s32 6, %v1345_v24 }
 0x610   :  { %p1239_p4 = pnand %p1238_p3, %p1232_p0 }
 0x611   :  { %v670_v31 = vsel %vm668_vm4, %v667_v29, %v1172_v27  ;;  %v669_v32 = vsel %vm668_vm4, %v666_v30, %v1171_v28  ;;  %v784_v23 = vrot.slane %v1351_v26, %v783_v22 }
 0x612   :  { %v671_v33 = vpack.c.bf16 %v670_v31, %v669_v32 }
 0x614   :  { %1109 = vmatmul.mubr.msk.bf16.vlgmr.msra.gmra.mrb[12].mxu1 %vm33_vm0, %v671_v33 }
 0x615   :  { %1136 = vmatprep.mubr.msk.bf16.mxu1 %vm1256_vm1, %v1255_v15  ;;  %1121 = vmatpush3.bf16.msra.mxu1 %v1179_v13 }
 0x616   :  { %1122 = vmatprep.subr.bf16.mxu1 %v1255_v15 }
 0x619   :  { %1123 = vmatpush3.bf16.msra.mxu1 %v1180_v14 }
 0x61a   :  { %1124 = vmatprep.subr.bf16.mxu1 %v1255_v15 }
 0x61d   :  { %1125 = vmatpush3.bf16.msra.mxu1 %v1181_v16 }
 0x61e   :  { %1126 = vmatprep.subr.bf16.mxu1 %v1255_v15 }
 0x621   :  { %1127 = vmatpush3.bf16.msra.mxu1 %v1182_v17 }
 0x622   :  { %1128 = vmatprep.subr.bf16.mxu1 %v1255_v15 }
 0x625   :  { %1129 = vmatpush3.bf16.msra.mxu1 %v1183_v18 }
 0x626   :  { %1130 = vmatprep.subr.bf16.mxu1 %v1255_v15 }
 0x629   :  { %1131 = vmatpush3.bf16.msra.mxu1 %v1184_v19 }
 0x62a   :  { %1132 = vmatprep.subr.bf16.mxu1 %v1255_v15 }
 0x62d   :  { %1133 = vmatpush3.bf16.msra.mxu1 %v1185_v20 }
 0x62e   :  { %1134 = vmatprep.subr.bf16.mxu1 %v1255_v15 }
 0x631   :  { %1135 = vmatpush3.bf16.msra.mxu1 %v1186_v21 }
 0x6e7   :  { %v729_v47 = vpop.f32.mrb[12].mxu1 }
 0x6e8   :  { %v730_v36 = vadd.f32 %v729_v47, %v679_v35  ;;  %v1110_v37 = vpop.f32.mrb[13].mxu1 }
 0x6e9   :  { %v732_v38 = vpop.f32.mrb[14].mxu1 }
 0x6ea   :  { %v1452_v39 = vadd.f32 %v730_v36, %v1316_v0  ;;  %v733_v40 = vadd.f32 %v732_v38, %v679_v35  ;;  %v1111_v41 = vpop.f32.mrb[15].mxu1 }
 0x6ec   :  { %v1455_v42 = vadd.f32 %v733_v40, %v1321_v1  ;;  %v738_v43 = vsel %vm33_vm0, %v1452_v39, 0.0 }
 0x6ed   :  { %739 = vadd.xlane.f32.xlu0 %v738_v43 }
 0x6ee   :  { %v741_v44 = vsel %vm33_vm0, %v1455_v42, 0.0 }
 0x6ef   :  { %742 = vadd.xlane.f32.xlu1 %v741_v44 }
 0x77a   :  { %v740_v45 = vpop.xlane.xlu0 %739 }
 0x77b   :  { %v744_v46 = vmul.f32 0.03125, %v740_v45 }
 0x77c   :  { %v743_v48 = vpop.xlane.xlu1 %742 }
 0x77d   :  { %v746_v49 = vsub.f32 %v1452_v39, %v744_v46  ;;  %v745_v0 = vmul.f32 0.03125, %v743_v48 }
 0x77f   :  { %v747_v50 = vsub.f32 %v1455_v42, %v745_v0  ;;  %v748_v51 = vmul.f32 %v746_v49, %v746_v49 }
 0x781   :  { %v750_v1 = vsel %vm33_vm0, %v748_v51, 0.0  ;;  %v749_v52 = vmul.f32 %v747_v50, %v747_v50  ;;  %v878_v51 = vsub.s32 5, %v1345_v24 }
 0x782   :  { %751 = vadd.xlane.f32.xlu0 %v750_v1 }
 0x783   :  { %v753_v53 = vsel %vm33_vm0, %v749_v52, 0.0  ;;  %v879_v1 = vrot.slane %v1351_v26, %v878_v51 }
 0x786   :  { %754 = vadd.xlane.f32.xlu0 %v753_v53 }
 0x80f   :  { %v752_v56 = vpop.xlane.xlu0 %751 }
 0x810   :  { %v756_v57 = vmul.f32 0.03125, %v752_v56 }
 0x812   :  { %v758_v58 = vadd.f32 1e-05, %v756_v57 }
 0x813   :  { %v755_v59 = vpop.xlane.xlu0 %754 }
 0x814   :  { %1223 = vrsqrt.f32 %v758_v58  ;;  %v757_v60 = vmul.f32 0.03125, %v755_v59 }
 0x816   :  { %v759_v61 = vadd.f32 1e-05, %v757_v60 }
 0x818   :  { %1225 = vrsqrt.f32 %v759_v61 }
 0x81e   :  { %v1224_v63 = vpop.eup %1223 }
 0x81f   :  { %v762_v3 = vmul.f32 %v1224_v63, %v746_v49 }
 0x821   :  { %v768_v6 = vmul.f32 %v767_v2, %v762_v3 }
 0x822   :  { %v1226_v5 = vpop.eup %1225 }
 0x823   :  { %v763_v7 = vmul.f32 %v1226_v5, %v747_v50  ;;  %v774_v10 = vadd.f32 %v773_v8, %v768_v6 }
 0x825   :  { %v769_v9 = vmul.f32 %v767_v2, %v763_v7 }
 0x827   :  { %v775_v11 = vadd.f32 %v773_v8, %v769_v9 }
 0x829   :  { %v776_v12 = vpack.c.bf16 %v775_v11, %v774_v10 }
 0x82b   :  { %1117 = vmatmul.mubr.msk.bf16.vlgmr.msra.gmra.mrb[24].mxu0 %vm33_vm0, %v776_v12 }
 0x8fe   :  { %v834_v25 = vpop.f32.mrb[24].mxu0 }
 0x8ff   :  { %v835_v27 = vadd.f32 %v834_v25, %v784_v23  ;;  %v1118_v28 = vpop.f32.mrb[25].mxu0 }
 0x900   :  { %v837_v29 = vpop.f32.mrb[26].mxu0 }
 0x901   :  { %v843_v30 = vmul.f32 0.044715, %v835_v27  ;;  %v838_v31 = vadd.f32 %v837_v29, %v784_v23  ;;  %v1119_v32 = vpop.f32.mrb[27].mxu0  ;;  %v841_v45 = vmul.f32 0.5, %v835_v27 }
 0x903   :  { %v845_v33 = vmul.f32 %v843_v30, %v835_v27  ;;  %v844_v34 = vmul.f32 0.044715, %v838_v31  ;;  %v842_v46 = vmul.f32 0.5, %v838_v31 }
 0x905   :  { %v847_v35 = vmul.f32 %v845_v33, %v835_v27  ;;  %v846_v47 = vmul.f32 %v844_v34, %v838_v31 }
 0x907   :  { %v849_v36 = vadd.f32 %v847_v35, %v835_v27  ;;  %v848_v37 = vmul.f32 %v846_v47, %v838_v31 }
 0x909   :  { %v851_v38 = vmul.f32 0.7978846, %v849_v36  ;;  %v850_v15 = vadd.f32 %v848_v37, %v838_v31 }
 0x90b   :  { %1227 = vtanh.f32 %v851_v38  ;;  %v852_v40 = vmul.f32 0.7978846, %v850_v15 }
 0x90d   :  { %1229 = vtanh.f32 %v852_v40 }
 0x915   :  { %v1228_v41 = vpop.eup %1227 }
 0x916   :  { %v855_v43 = vadd.f32 1.0, %v1228_v41 }
 0x917   :  { %v1230_v44 = vpop.eup %1229 }
 0x918   :  { %v856_v48 = vadd.f32 1.0, %v1230_v44  ;;  %v857_v49 = vmul.f32 %v855_v43, %v841_v45 }
 0x91a   :  { %v858_v0 = vmul.f32 %v856_v48, %v842_v46 }
 0x91c   :  { %v859_v50 = vpack.c.bf16 %v858_v0, %v857_v49 }
 0x91e   :  { %1137 = vmatmul.mubr.bf16.vlgmr.msra.gmra.mrb[16].mxu1 %v859_v50 }
 0x9f1   :  { %v962_v52 = vpop.f32.mrb[16].mxu1 }
 0x9f2   :  { %v963_v53 = vadd.f32 %v962_v52, %v879_v1  ;;  %v1138_v54 = vpop.f32.mrb[17].mxu1 }
 0x9f3   :  { %v965_v55 = vpop.f32.mrb[18].mxu1 }
 0x9f4   :  { %v969_v56 = vadd.f32 %v963_v53, %v1452_v39  ;;  %v966_v57 = vadd.f32 %v965_v55, %v879_v1  ;;  %v1139_v58 = vpop.f32.mrb[19].mxu1 }
 0x9f6   :  { %971 = vst.msk [vmem:[#allocation2] sm:$0xff] %vm33_vm0, %v969_v56  ;;  %v970_v59 = vadd.f32 %v966_v57, %v1455_v42 }
 0x9f8   :  { %972 = vst.msk [vmem:[#allocation2 + $0x8] sm:$0xff] %vm33_vm0, %v970_v59 }
 0x9f9   :  { %1242 = shalt.err (!%p1239_p4)
}
 0x9fa   :  { %s1243_s25 = scalar_lea.hbm %s1536_s7, 256 }
 0x9fb   :  { %p1244_p5 = scmp.ne.s32.totalorder %s1536_s7, %s1243_s25  ;;  %p1247_p6 = scmp.lt.u32.totalorder %s1243_s25, %s1536_s7 }
 0x9fd   :  { %p1249_p7 = pnand %p1247_p6, %p1244_p5 }
 0x9ff   :  { %1252 = shalt.err (!%p1249_p7)
}
 0xa00   :  { %s1272_s28 = smov 128  }
 0xa01   :  { %984 = dma.vmem_to_hbm [thread:$0]  %s979_s20, 256, %s1536_s7, [#allocation3], %s1272_s28, %s1272_s28, %s1268_s24  }
 0xa02   :  { %1253 = dma.done.wait [#allocation3], 256  }
 0xa03   :  { %1254 = vsyncadd [#allocation3], 4294967040 }
 0xa04   :  { %988 = vsyncpa [#allocation3], 1 }

</bundles_post_ra>
